<compile_context>
chip_gen: v6e
topology: v6e:2x2x1
jax: 0.10.0
libtpu: 0.0.40
codegen_flags: <defaults>
</compile_context>

<pallas_src>
import functools

import jax
import jax.numpy as jnp
from jax import lax
from jax.experimental import pallas as pl
from jax.experimental.pallas import tpu as pltpu


_VMEM_SPEC = pl.BlockSpec(memory_space=pltpu.MemorySpace.VMEM)


def module_list_chain_kernel(x_ref, p_ref, o_ref):
    """Exact forward of the ModuleList module on one VMEM-resident tile.

    p_ref is the packed parameter slab, shape (2P, F):
      rows [0, F)        : w0  (out, in)
      row  F             : b0
      rows [P, P+F)      : w1
      row  P+F           : b1
    with P an 8-aligned chunk stride (>= F+1).
    """
    F = x_ref.shape[1]
    P = p_ref.shape[0] // 2

    # Static slices of the slab — views, no extra DMAs.
    w0 = p_ref[0:F, :]
    b0 = p_ref[F:F + 1, :]                 # (1, F) row; implicit broadcast in the add
    w1 = p_ref[P:P + F, :]
    b1 = p_ref[P + F:P + F + 1, :]

    # bf16 operands for the MXU (hoisted once); accumulation + elementwise stay f32.
    w0b = w0.astype(jnp.bfloat16)
    w1b = w1.astype(jnp.bfloat16)

    def lin(v, wb, b_row):
        y = lax.dot_general(
            v.astype(jnp.bfloat16), wb,
            dimension_numbers=(((1,), (1,)), ((), ())),   # y = v @ W^T
            preferred_element_type=jnp.float32,
        )
        return y + b_row

    relu = lambda v: jnp.maximum(v, 0.0)
    lin0 = lambda v: lin(v, w0b, b0)
    lin1 = lambda v: lin(v, w1b, b1)

    x = x_ref[...]                                        # f32

    # Loop 1: for i in range(len(layers)): x = layers[i](x)
    x = relu(lin1(relu(lin0(x))))
    # Loop 2: for layer in layers: x = layer(x)
    x = relu(lin1(relu(lin0(x))))

    # Loop 3: for layer, val in zip(layers, (x, x, x, x)): x = layer(x) + val
    # The tuple (x, x, x, x) is built once -> same residual `v` each step.
    v = x
    x = lin0(x) + v
    x = relu(x) + v
    x = lin1(x) + v
    x = relu(x) + v

    # Loop 4: for layer, val in zip(layers, (1, 2, 3, 4)): x = layer(x) + val
    x = lin0(x) + 1.0
    x = relu(x) + 2.0
    x = lin1(x) + 3.0
    x = relu(x) + 4.0

    # Loop 5: for idx, layer in enumerate(layers): x = layer(x) * idx
    x = lin0(x) * 0.0
    x = relu(x) * 1.0
    x = lin1(x) * 2.0
    x = relu(x) * 3.0

    o_ref[...] = x.astype(o_ref.dtype)


def _pack_params(w0, b0, w1, b1):
    """Pack (w0, b0, w1, b1) into one 8-row-aligned (2P, F) f32 slab."""
    F = w0.shape[0]
    P = ((F + 1 + 7) // 8) * 8
    pad = jnp.zeros((P - F - 1, F), jnp.float32)
    return jnp.concatenate(
        [w0.astype(jnp.float32), b0[None, :].astype(jnp.float32), pad,
         w1.astype(jnp.float32), b1[None, :].astype(jnp.float32), pad],
        axis=0,
    )


def _call_chain(x, params):
    B, F = x.shape
    cost = pl.CostEstimate(
        flops=2 * B * F * F * 8,            # 8 small matmuls
        transcendentals=0,
        bytes_accessed=4 * (x.size + params.size + B * F),
    )
    return pl.pallas_call(
        module_list_chain_kernel,
        out_shape=jax.ShapeDtypeStruct((B, F), x.dtype),
        in_specs=[_VMEM_SPEC, _VMEM_SPEC],
        out_specs=_VMEM_SPEC,
        cost_estimate=cost,
    )(x, params)


@functools.partial(jax.jit, static_argnames=("assume_finite",))
def module_list_forward(x, w0, b0, w1, b1, *, assume_finite=False):
    """x: (B, 10). w*: PyTorch-layout (out, in) weights; b*: (out,).

    assume_finite=False (default): exact full-chain Pallas kernel (strict module
    semantics).  assume_finite=True: algebraic fold — for finite inputs the `* 0.0`
    in loop 5 makes the output exactly 3*relu(2*b1) per row, so it is computed in
    plain fused XLA with no Pallas dispatch at all.
    """
    if assume_finite:
        row = 3.0 * jnp.maximum(2.0 * b1, 0.0)
        return jnp.broadcast_to(row[None, :], x.shape).astype(x.dtype)
    params = _pack_params(w0, b0, w1, b1)   # tiny concat, fused under jit
    return _call_chain(x, params)


if __name__ == "__main__":
    key = jax.random.PRNGKey(0)
    kx, kw0, kb0, kw1, kb1 = jax.random.split(key, 5)

    B, F = 8, 10
    x = jax.random.normal(kx, (B, F), dtype=jnp.float32)
    # torch.nn.Linear(10, 10) params: weight (10, 10), bias (10,)
    bound = 1.0 / (F ** 0.5)
    w0 = jax.random.uniform(kw0, (F, F), jnp.float32, -bound, bound)
    b0 = jax.random.uniform(kb0, (F,), jnp.float32, -bound, bound)
    w1 = jax.random.uniform(kw1, (F, F), jnp.float32, -bound, bound)
    b1 = jax.random.uniform(kb1, (F,), jnp.float32, -bound, bound)

    # Pure-JAX full-chain reference (highest matmul precision).
    def ref(x):
        hp = lax.Precision.HIGHEST
        lin0 = lambda v: jnp.dot(v, w0.T, precision=hp) + b0
        lin1 = lambda v: jnp.dot(v, w1.T, precision=hp) + b1
        relu = lambda v: jnp.maximum(v, 0.0)
        x = relu(lin1(relu(lin0(x))))
        x = relu(lin1(relu(lin0(x))))
        v = x
        x = lin0(x) + v
        x = relu(x) + v
        x = lin1(x) + v
        x = relu(x) + v
        x = lin0(x) + 1.0
        x = relu(x) + 2.0
        x = lin1(x) + 3.0
        x = relu(x) + 4.0
        x = lin0(x) * 0.0
        x = relu(x) * 1.0
        x = lin1(x) * 2.0
        x = relu(x) * 3.0
        return x

    ref_out = ref(x)

    out_exact = module_list_forward(x, w0, b0, w1, b1)                      # default
    out_fold = module_list_forward(x, w0, b0, w1, b1, assume_finite=True)   # fused XLA
    jax.block_until_ready((out_exact, out_fold))

    assert jnp.allclose(out_exact, ref_out, atol=1e-4, rtol=1e-4), "exact kernel mismatch"
    assert jnp.allclose(out_fold, ref_out, atol=1e-4, rtol=1e-4), "folded path mismatch"
    print("KERNEL_OK")
</pallas_src>

<mosaic_0001>
module attributes {stable_mosaic.version = 11 : i64} {
  func.func @module_list_chain_kernel(%arg0: memref<8x10xf32, #tpu.memory_space<vmem>>, %arg1: memref<32x10xf32, #tpu.memory_space<vmem>>, %arg2: memref<8x10xf32, #tpu.memory_space<vmem>>) attributes {dimension_semantics = [], scalar_prefetch = 0 : i64, scratch_operands = 0 : i64, tpu.core_type = #tpu.core_type<tc>} {
    %c0 = arith.constant 0 : index
    %c0_0 = arith.constant 0 : index
    %0 = vector.load %arg1[%c0, %c0_0] : memref<32x10xf32, #tpu.memory_space<vmem>>, vector<10x10xf32>
    %c10 = arith.constant 10 : index
    %c0_1 = arith.constant 0 : index
    %1 = vector.load %arg1[%c10, %c0_1] : memref<32x10xf32, #tpu.memory_space<vmem>>, vector<1x10xf32>
    %c16 = arith.constant 16 : index
    %c0_2 = arith.constant 0 : index
    %2 = vector.load %arg1[%c16, %c0_2] : memref<32x10xf32, #tpu.memory_space<vmem>>, vector<10x10xf32>
    %c26 = arith.constant 26 : index
    %c0_3 = arith.constant 0 : index
    %3 = vector.load %arg1[%c26, %c0_3] : memref<32x10xf32, #tpu.memory_space<vmem>>, vector<1x10xf32>
    %4 = arith.truncf %0 : vector<10x10xf32> to vector<10x10xbf16>
    %5 = arith.truncf %2 : vector<10x10xf32> to vector<10x10xbf16>
    %c0_4 = arith.constant 0 : index
    %c0_5 = arith.constant 0 : index
    %6 = vector.load %arg0[%c0_4, %c0_5] : memref<8x10xf32, #tpu.memory_space<vmem>>, vector<8x10xf32>
    %7 = arith.truncf %6 : vector<8x10xf32> to vector<8x10xbf16>
    %cst = arith.constant dense<0.000000e+00> : vector<8x10xf32>
    %8 = tpu.matmul %7, %4, %cst {dimension_numbers = #tpu.dot_dimension_numbers<[1], [1], [0], [0], [0, 0, 1, 0], [], []>} : vector<8x10xbf16>, vector<10x10xbf16>, vector<8x10xf32> -> vector<8x10xf32>
    %9 = vector.broadcast %1 : vector<1x10xf32> to vector<8x10xf32>
    %10 = arith.addf %8, %9 : vector<8x10xf32>
    %cst_6 = arith.constant 0.000000e+00 : f32
    %11 = vector.broadcast %cst_6 : f32 to vector<8x10xf32>
    %12 = arith.maximumf %10, %11 : vector<8x10xf32>
    %13 = arith.truncf %12 : vector<8x10xf32> to vector<8x10xbf16>
    %cst_7 = arith.constant dense<0.000000e+00> : vector<8x10xf32>
    %14 = tpu.matmul %13, %5, %cst_7 {dimension_numbers = #tpu.dot_dimension_numbers<[1], [1], [0], [0], [0, 0, 1, 0], [], []>} : vector<8x10xbf16>, vector<10x10xbf16>, vector<8x10xf32> -> vector<8x10xf32>
    %15 = vector.broadcast %3 : vector<1x10xf32> to vector<8x10xf32>
    %16 = arith.addf %14, %15 : vector<8x10xf32>
    %cst_8 = arith.constant 0.000000e+00 : f32
    %17 = vector.broadcast %cst_8 : f32 to vector<8x10xf32>
    %18 = arith.maximumf %16, %17 : vector<8x10xf32>
    %19 = arith.truncf %18 : vector<8x10xf32> to vector<8x10xbf16>
    %cst_9 = arith.constant dense<0.000000e+00> : vector<8x10xf32>
    %20 = tpu.matmul %19, %4, %cst_9 {dimension_numbers = #tpu.dot_dimension_numbers<[1], [1], [0], [0], [0, 0, 1, 0], [], []>} : vector<8x10xbf16>, vector<10x10xbf16>, vector<8x10xf32> -> vector<8x10xf32>
    %21 = vector.broadcast %1 : vector<1x10xf32> to vector<8x10xf32>
    %22 = arith.addf %20, %21 : vector<8x10xf32>
    %cst_10 = arith.constant 0.000000e+00 : f32
    %23 = vector.broadcast %cst_10 : f32 to vector<8x10xf32>
    %24 = arith.maximumf %22, %23 : vector<8x10xf32>
    %25 = arith.truncf %24 : vector<8x10xf32> to vector<8x10xbf16>
    %cst_11 = arith.constant dense<0.000000e+00> : vector<8x10xf32>
    %26 = tpu.matmul %25, %5, %cst_11 {dimension_numbers = #tpu.dot_dimension_numbers<[1], [1], [0], [0], [0, 0, 1, 0], [], []>} : vector<8x10xbf16>, vector<10x10xbf16>, vector<8x10xf32> -> vector<8x10xf32>
    %27 = vector.broadcast %3 : vector<1x10xf32> to vector<8x10xf32>
    %28 = arith.addf %26, %27 : vector<8x10xf32>
    %cst_12 = arith.constant 0.000000e+00 : f32
    %29 = vector.broadcast %cst_12 : f32 to vector<8x10xf32>
    %30 = arith.maximumf %28, %29 : vector<8x10xf32>
    %31 = arith.truncf %30 : vector<8x10xf32> to vector<8x10xbf16>
    %cst_13 = arith.constant dense<0.000000e+00> : vector<8x10xf32>
    %32 = tpu.matmul %31, %4, %cst_13 {dimension_numbers = #tpu.dot_dimension_numbers<[1], [1], [0], [0], [0, 0, 1, 0], [], []>} : vector<8x10xbf16>, vector<10x10xbf16>, vector<8x10xf32> -> vector<8x10xf32>
    %33 = vector.broadcast %1 : vector<1x10xf32> to vector<8x10xf32>
    %34 = arith.addf %32, %33 : vector<8x10xf32>
    %35 = arith.addf %34, %30 : vector<8x10xf32>
    %cst_14 = arith.constant 0.000000e+00 : f32
    %36 = vector.broadcast %cst_14 : f32 to vector<8x10xf32>
    %37 = arith.maximumf %35, %36 : vector<8x10xf32>
    %38 = arith.addf %37, %30 : vector<8x10xf32>
    %39 = arith.truncf %38 : vector<8x10xf32> to vector<8x10xbf16>
    %cst_15 = arith.constant dense<0.000000e+00> : vector<8x10xf32>
    %40 = tpu.matmul %39, %5, %cst_15 {dimension_numbers = #tpu.dot_dimension_numbers<[1], [1], [0], [0], [0, 0, 1, 0], [], []>} : vector<8x10xbf16>, vector<10x10xbf16>, vector<8x10xf32> -> vector<8x10xf32>
    %41 = vector.broadcast %3 : vector<1x10xf32> to vector<8x10xf32>
    %42 = arith.addf %40, %41 : vector<8x10xf32>
    %43 = arith.addf %42, %30 : vector<8x10xf32>
    %cst_16 = arith.constant 0.000000e+00 : f32
    %44 = vector.broadcast %cst_16 : f32 to vector<8x10xf32>
    %45 = arith.maximumf %43, %44 : vector<8x10xf32>
    %46 = arith.addf %45, %30 : vector<8x10xf32>
    %47 = arith.truncf %46 : vector<8x10xf32> to vector<8x10xbf16>
    %cst_17 = arith.constant dense<0.000000e+00> : vector<8x10xf32>
    %48 = tpu.matmul %47, %4, %cst_17 {dimension_numbers = #tpu.dot_dimension_numbers<[1], [1], [0], [0], [0, 0, 1, 0], [], []>} : vector<8x10xbf16>, vector<10x10xbf16>, vector<8x10xf32> -> vector<8x10xf32>
    %49 = vector.broadcast %1 : vector<1x10xf32> to vector<8x10xf32>
    %50 = arith.addf %48, %49 : vector<8x10xf32>
    %cst_18 = arith.constant 1.000000e+00 : f32
    %51 = vector.broadcast %cst_18 : f32 to vector<8x10xf32>
    %52 = arith.addf %50, %51 : vector<8x10xf32>
    %cst_19 = arith.constant 0.000000e+00 : f32
    %53 = vector.broadcast %cst_19 : f32 to vector<8x10xf32>
    %54 = arith.maximumf %52, %53 : vector<8x10xf32>
    %cst_20 = arith.constant 2.000000e+00 : f32
    %55 = vector.broadcast %cst_20 : f32 to vector<8x10xf32>
    %56 = arith.addf %54, %55 : vector<8x10xf32>
    %57 = arith.truncf %56 : vector<8x10xf32> to vector<8x10xbf16>
    %cst_21 = arith.constant dense<0.000000e+00> : vector<8x10xf32>
    %58 = tpu.matmul %57, %5, %cst_21 {dimension_numbers = #tpu.dot_dimension_numbers<[1], [1], [0], [0], [0, 0, 1, 0], [], []>} : vector<8x10xbf16>, vector<10x10xbf16>, vector<8x10xf32> -> vector<8x10xf32>
    %59 = vector.broadcast %3 : vector<1x10xf32> to vector<8x10xf32>
    %60 = arith.addf %58, %59 : vector<8x10xf32>
    %cst_22 = arith.constant 3.000000e+00 : f32
    %61 = vector.broadcast %cst_22 : f32 to vector<8x10xf32>
    %62 = arith.addf %60, %61 : vector<8x10xf32>
    %cst_23 = arith.constant 0.000000e+00 : f32
    %63 = vector.broadcast %cst_23 : f32 to vector<8x10xf32>
    %64 = arith.maximumf %62, %63 : vector<8x10xf32>
    %cst_24 = arith.constant 4.000000e+00 : f32
    %65 = vector.broadcast %cst_24 : f32 to vector<8x10xf32>
    %66 = arith.addf %64, %65 : vector<8x10xf32>
    %67 = arith.truncf %66 : vector<8x10xf32> to vector<8x10xbf16>
    %cst_25 = arith.constant dense<0.000000e+00> : vector<8x10xf32>
    %68 = tpu.matmul %67, %4, %cst_25 {dimension_numbers = #tpu.dot_dimension_numbers<[1], [1], [0], [0], [0, 0, 1, 0], [], []>} : vector<8x10xbf16>, vector<10x10xbf16>, vector<8x10xf32> -> vector<8x10xf32>
    %69 = vector.broadcast %1 : vector<1x10xf32> to vector<8x10xf32>
    %70 = arith.addf %68, %69 : vector<8x10xf32>
    %cst_26 = arith.constant 0.000000e+00 : f32
    %71 = vector.broadcast %cst_26 : f32 to vector<8x10xf32>
    %72 = arith.mulf %70, %71 : vector<8x10xf32>
    %cst_27 = arith.constant 0.000000e+00 : f32
    %73 = vector.broadcast %cst_27 : f32 to vector<8x10xf32>
    %74 = arith.maximumf %72, %73 : vector<8x10xf32>
    %cst_28 = arith.constant 1.000000e+00 : f32
    %75 = vector.broadcast %cst_28 : f32 to vector<8x10xf32>
    %76 = arith.mulf %74, %75 : vector<8x10xf32>
    %77 = arith.truncf %76 : vector<8x10xf32> to vector<8x10xbf16>
    %cst_29 = arith.constant dense<0.000000e+00> : vector<8x10xf32>
    %78 = tpu.matmul %77, %5, %cst_29 {dimension_numbers = #tpu.dot_dimension_numbers<[1], [1], [0], [0], [0, 0, 1, 0], [], []>} : vector<8x10xbf16>, vector<10x10xbf16>, vector<8x10xf32> -> vector<8x10xf32>
    %79 = vector.broadcast %3 : vector<1x10xf32> to vector<8x10xf32>
    %80 = arith.addf %78, %79 : vector<8x10xf32>
    %cst_30 = arith.constant 2.000000e+00 : f32
    %81 = vector.broadcast %cst_30 : f32 to vector<8x10xf32>
    %82 = arith.mulf %80, %81 : vector<8x10xf32>
    %cst_31 = arith.constant 0.000000e+00 : f32
    %83 = vector.broadcast %cst_31 : f32 to vector<8x10xf32>
    %84 = arith.maximumf %82, %83 : vector<8x10xf32>
    %cst_32 = arith.constant 3.000000e+00 : f32
    %85 = vector.broadcast %cst_32 : f32 to vector<8x10xf32>
    %86 = arith.mulf %84, %85 : vector<8x10xf32>
    %c0_33 = arith.constant 0 : index
    %c0_34 = arith.constant 0 : index
    %87 = vector.load %arg2[%c0_33, %c0_34] : memref<8x10xf32, #tpu.memory_space<vmem>>, vector<8x10xf32>
    tpu.vector_store %arg2[%c0_33, %c0_34], %86 {strides = array<i32>} : memref<8x10xf32, #tpu.memory_space<vmem>>, vector<8x10xf32>,
    return
  }
}

</mosaic_0001>

<bundles_post_ra>
// kernel: module_list_forward.1
= control target key start
LH: loop header
LB: loop body
LE: loop exit
PB: predicated region body
PF: predicated region fallthrough
CT: control target
= control target key end

     0   :  { %vm27_vm0 = vcmask 80896   ;;  %v630_v2 = vmov 0.0   ;;  %vm631_vm1 = vmmov 0   ;;  %s743_s0 = inlined_call_operand.vmem [shape: f32[8,10], index: 0, kind: input, shape index: {}]   ;;  %s744_s1 = inlined_call_operand.vmem [shape: f32[32,10], index: 1, kind: input, shape index: {}]   ;;  %s745_s2 = inlined_call_operand.hbm [shape: f32[8,10], index: 2, kind: output, shape index: {}]  }
   0x1   :  { %v13_v0 = vld [vmem:[%s744_s1] sm:$0xff]  ;;  %v14_v1 = vld [vmem:[%s744_s1 + $0x8] sm:$0x3]  ;;  %545 = vmatprep.subr.bf16.mxu0 %v630_v2  ;;  %547 = vmatprep.mubr.msk.bf16.mxu0 %vm631_vm1, %v630_v2 }
   0x2   :  { %v19_v3 = vpack.c.bf16 %v14_v1, %v13_v0 }
   0x3   :  { %7 = vsyncpa [#allocation3], 0  ;;  %551 = vmatprep.subr.bf16.mxu1 %v630_v2  ;;  %553 = vmatprep.mubr.msk.bf16.mxu1 %vm631_vm1, %v630_v2  ;;  %v21_v5 = vld [vmem:[%s743_s0] sm:$0xff]  ;;  %v16_v7 = vld [vmem:[%s744_s1 + $0x10] sm:$0xff] }
   0x4   :  { %v661_v4 = vsel %vm27_vm0, %v19_v3, 0  ;;  %v22_v6 = vpack.c.bf16 %v21_v5, %v21_v5  ;;  %v17_v8 = vld [vmem:[%s744_s1 + $0x18] sm:$0x3]  ;;  %v687_v11 = vld [vmem:[%s744_s1 + $0xa] ss:$0 sm:$0xff] }
   0x5   :  { %546 = vmatpush3.bf16.xpose.msra.mxu0 %v661_v4  ;;  %v20_v9 = vpack.c.bf16 %v17_v8, %v16_v7  ;;  %v698_v19 = vld [vmem:[%s744_s1 + $0x1a] ss:$0 sm:$0xff]  ;;  %s632_s1 = smov [#allocation2]  }
   0x6   :  { %557 = vmatprep.subr.bf16.mxu0 %v630_v2  ;;  %s505_s22 = sshll.u32 %s632_s1, 4  ;;  %s506_s22 = int_to_ptr.vmem [resolvable:$true] %s505_s22 }
   0x7   :  { %v680_v10 = vsel %vm27_vm0, %v20_v9, 0  ;;  %s608_s23 = scalar_lea.vmem %s506_s22, 128  ;;  %p613_p1 = scmp.lt.s32.totalorder %s506_s22, %s506_s22 }
   0x8   :  { %552 = vmatpush3.bf16.xpose.msra.mxu1 %v680_v10  ;;  %p609_p0 = scmp.ne.s32.totalorder %s506_s22, %s608_s23  ;;  %p614_p2 = scmp.lt.s32.totalorder %s608_s23, %s608_s23 }
   0x9   :  { %563 = vmatprep.subr.bf16.mxu1 %v630_v2 }
   0xa   :  { %p615_p3 = por %p614_p2, %p613_p1 }
   0xc   :  { %548 = vmatmul.mubr.msk.bf16.vlgmr.msra.gmra.mxu0 %vm27_vm0, %v22_v6  ;;  %p616_p4 = pnand %p615_p3, %p609_p0 }
   0xd   :  { %558 = vmatpush3.bf16.xpose.msra.mxu0 %v661_v4  ;;  %559 = vmatprep.mubr.msk.bf16.mxu0 %vm631_vm1, %v630_v2 }
   0xe   :  { %569 = vmatprep.subr.bf16.mxu0 %v630_v2 }
  0xcc   :  { %v68_v12 = vpop.f32.mrf.mxu0 }
  0xcd   :  { %v69_v13 = vadd.f32 %v687_v11, %v68_v12 }
  0xce   :  { %v549_v14 = vpop.f32.mrf.mxu0 }
  0xcf   :  { %v74_v15 = vmax.f32 %v69_v13, 0.0 }
  0xd0   :  { %v71_v16 = vpop.f32.mrf.mxu0 }
  0xd1   :  { %v75_v17 = vpack.c.bf16 %v74_v15, %v74_v15 }
  0xd2   :  { %v550_v18 = vpop.f32.mrf.mxu0 }
  0xd3   :  { %554 = vmatmul.mubr.msk.bf16.vlgmr.msra.gmra.mxu1 %vm27_vm0, %v75_v17 }
  0xd4   :  { %564 = vmatpush3.bf16.xpose.msra.mxu1 %v680_v10  ;;  %565 = vmatprep.mubr.msk.bf16.mxu1 %vm631_vm1, %v630_v2 }
  0xd5   :  { %575 = vmatprep.subr.bf16.mxu1 %v630_v2 }
 0x193   :  { %v120_v20 = vpop.f32.mrf.mxu1 }
 0x194   :  { %v121_v21 = vadd.f32 %v698_v19, %v120_v20 }
 0x195   :  { %v555_v22 = vpop.f32.mrf.mxu1 }
 0x196   :  { %v126_v23 = vmax.f32 %v121_v21, 0.0 }
 0x197   :  { %v123_v24 = vpop.f32.mrf.mxu1 }
 0x198   :  { %v127_v25 = vpack.c.bf16 %v126_v23, %v126_v23 }
 0x199   :  { %v556_v26 = vpop.f32.mrf.mxu1 }
 0x19a   :  { %560 = vmatmul.mubr.msk.bf16.vlgmr.msra.gmra.mxu0 %vm27_vm0, %v127_v25 }
 0x19b   :  { %570 = vmatpush3.bf16.xpose.msra.mxu0 %v661_v4  ;;  %571 = vmatprep.mubr.msk.bf16.mxu0 %vm631_vm1, %v630_v2 }
 0x19c   :  { %581 = vmatprep.subr.bf16.mxu0 %v630_v2 }
 0x25a   :  { %v165_v27 = vpop.f32.mrf.mxu0 }
 0x25b   :  { %v166_v28 = vadd.f32 %v687_v11, %v165_v27 }
 0x25c   :  { %v561_v29 = vpop.f32.mrf.mxu0 }
 0x25d   :  { %v171_v30 = vmax.f32 %v166_v28, 0.0 }
 0x25e   :  { %v168_v31 = vpop.f32.mrf.mxu0 }
 0x25f   :  { %v172_v32 = vpack.c.bf16 %v171_v30, %v171_v30 }
 0x260   :  { %v562_v33 = vpop.f32.mrf.mxu0 }
 0x261   :  { %566 = vmatmul.mubr.msk.bf16.vlgmr.msra.gmra.mxu1 %vm27_vm0, %v172_v32 }
 0x262   :  { %576 = vmatpush3.bf16.xpose.msra.mxu1 %v680_v10  ;;  %577 = vmatprep.mubr.msk.bf16.mxu1 %vm631_vm1, %v630_v2 }
 0x263   :  { %587 = vmatprep.subr.bf16.mxu1 %v630_v2 }
 0x321   :  { %v210_v34 = vpop.f32.mrf.mxu1 }
 0x322   :  { %v211_v35 = vadd.f32 %v698_v19, %v210_v34 }
 0x323   :  { %v567_v36 = vpop.f32.mrf.mxu1 }
 0x324   :  { %v216_v37 = vmax.f32 %v211_v35, 0.0 }
 0x325   :  { %v213_v38 = vpop.f32.mrf.mxu1 }
 0x326   :  { %v217_v39 = vpack.c.bf16 %v216_v37, %v216_v37 }
 0x327   :  { %v568_v40 = vpop.f32.mrf.mxu1 }
 0x328   :  { %572 = vmatmul.mubr.msk.bf16.vlgmr.msra.gmra.mxu0 %vm27_vm0, %v217_v39 }
 0x329   :  { %582 = vmatpush3.bf16.xpose.msra.mxu0 %v661_v4  ;;  %583 = vmatprep.mubr.msk.bf16.mxu0 %vm631_vm1, %v630_v2 }
 0x32a   :  { %593 = vmatprep.subr.bf16.mxu0 %v630_v2 }
 0x3e8   :  { %v255_v41 = vpop.f32.mrf.mxu0 }
 0x3e9   :  { %v256_v42 = vadd.f32 %v687_v11, %v255_v41 }
 0x3ea   :  { %v573_v43 = vpop.f32.mrf.mxu0 }
 0x3eb   :  { %v261_v44 = vadd.f32 %v256_v42, %v216_v37 }
 0x3ec   :  { %v258_v45 = vpop.f32.mrf.mxu0 }
 0x3ed   :  { %v262_v46 = vmax.f32 %v261_v44, 0.0 }
 0x3ee   :  { %v574_v47 = vpop.f32.mrf.mxu0 }
 0x3ef   :  { %v263_v48 = vadd.f32 %v262_v46, %v216_v37 }
 0x3f1   :  { %v264_v49 = vpack.c.bf16 %v263_v48, %v263_v48 }
 0x3f3   :  { %578 = vmatmul.mubr.msk.bf16.vlgmr.msra.gmra.mxu1 %vm27_vm0, %v264_v49 }
 0x3f4   :  { %588 = vmatpush3.bf16.xpose.msra.mxu1 %v680_v10  ;;  %589 = vmatprep.mubr.msk.bf16.mxu1 %vm631_vm1, %v630_v2 }
 0x3f5   :  { %599 = vmatprep.subr.bf16.mxu1 %v630_v2 }
 0x4b3   :  { %v302_v50 = vpop.f32.mrf.mxu1 }
 0x4b4   :  { %v303_v51 = vadd.f32 %v698_v19, %v302_v50 }
 0x4b5   :  { %v579_v52 = vpop.f32.mrf.mxu1 }
 0x4b6   :  { %v308_v53 = vadd.f32 %v303_v51, %v216_v37 }
 0x4b7   :  { %v305_v54 = vpop.f32.mrf.mxu1 }
 0x4b8   :  { %v309_v55 = vmax.f32 %v308_v53, 0.0 }
 0x4b9   :  { %v580_v56 = vpop.f32.mrf.mxu1 }
 0x4ba   :  { %v310_v57 = vadd.f32 %v309_v55, %v216_v37 }
 0x4bc   :  { %v311_v58 = vpack.c.bf16 %v310_v57, %v310_v57 }
 0x4be   :  { %584 = vmatmul.mubr.msk.bf16.vlgmr.msra.gmra.mxu0 %vm27_vm0, %v311_v58 }
 0x4bf   :  { %594 = vmatpush3.bf16.xpose.msra.mxu0 %v661_v4  ;;  %595 = vmatprep.mubr.msk.bf16.mxu0 %vm631_vm1, %v630_v2 }
 0x57e   :  { %v349_v59 = vpop.f32.mrf.mxu0 }
 0x57f   :  { %v350_v60 = vadd.f32 %v687_v11, %v349_v59 }
 0x580   :  { %v585_v61 = vpop.f32.mrf.mxu0 }
 0x581   :  { %v355_v62 = vadd.f32 1.0, %v350_v60 }
 0x582   :  { %v352_v63 = vpop.f32.mrf.mxu0 }
 0x583   :  { %v356_v0 = vmax.f32 %v355_v62, 0.0 }
 0x584   :  { %v586_v1 = vpop.f32.mrf.mxu0 }
 0x585   :  { %v357_v3 = vadd.f32 2.0, %v356_v0 }
 0x587   :  { %v358_v5 = vpack.c.bf16 %v357_v3, %v357_v3 }
 0x589   :  { %590 = vmatmul.mubr.msk.bf16.vlgmr.msra.gmra.mxu1 %vm27_vm0, %v358_v5 }
 0x58a   :  { %600 = vmatpush3.bf16.xpose.msra.mxu1 %v680_v10  ;;  %601 = vmatprep.mubr.msk.bf16.mxu1 %vm631_vm1, %v630_v2 }
 0x649   :  { %v396_v4 = vpop.f32.mrf.mxu1 }
 0x64a   :  { %v397_v6 = vadd.f32 %v698_v19, %v396_v4 }
 0x64b   :  { %v591_v7 = vpop.f32.mrf.mxu1 }
 0x64c   :  { %v402_v8 = vadd.f32 3.0, %v397_v6 }
 0x64d   :  { %v399_v9 = vpop.f32.mrf.mxu1 }
 0x64e   :  { %v403_v12 = vmax.f32 %v402_v8, 0.0 }
 0x64f   :  { %v592_v13 = vpop.f32.mrf.mxu1 }
 0x650   :  { %v404_v14 = vadd.f32 4.0, %v403_v12 }
 0x652   :  { %v405_v15 = vpack.c.bf16 %v404_v14, %v404_v14 }
 0x654   :  { %596 = vmatmul.mubr.msk.bf16.vlgmr.msra.gmra.mxu0 %vm27_vm0, %v405_v15 }
 0x714   :  { %v443_v16 = vpop.f32.mrf.mxu0 }
 0x715   :  { %v444_v17 = vadd.f32 %v687_v11, %v443_v16 }
 0x716   :  { %v597_v18 = vpop.f32.mrf.mxu0 }
 0x717   :  { %v449_v10 = vmul.f32 0.0, %v444_v17 }
 0x718   :  { %v446_v20 = vpop.f32.mrf.mxu0 }
 0x719   :  { %v450_v21 = vmax.f32 %v449_v10, 0.0 }
 0x71a   :  { %v598_v2 = vpop.f32.mrf.mxu0 }
 0x71b   :  { %v451_v22 = vpack.c.bf16 %v450_v21, %v450_v21 }
 0x71d   :  { %602 = vmatmul.mubr.msk.bf16.vlgmr.msra.gmra.mxu1 %vm27_vm0, %v451_v22 }
 0x7dd   :  { %v489_v23 = vpop.f32.mrf.mxu1 }
 0x7de   :  { %v490_v24 = vadd.f32 %v698_v19, %v489_v23 }
 0x7df   :  { %v603_v25 = vpop.f32.mrf.mxu1 }
 0x7e0   :  { %v495_v26 = vmul.f32 2.0, %v490_v24 }
 0x7e1   :  { %v492_v27 = vpop.f32.mrf.mxu1 }
 0x7e2   :  { %v496_v28 = vmax.f32 %v495_v26, 0.0 }
 0x7e3   :  { %v604_v29 = vpop.f32.mrf.mxu1 }
 0x7e4   :  { %v497_v30 = vmul.f32 3.0, %v496_v28 }
 0x7e6   :  { %498 = vst.msk [vmem:[#allocation2] sm:$0xff] %vm27_vm0, %v497_v30 }
 0x7e7   :  { %619 = shalt.err (!%p616_p4)
}
 0x7e8   :  { %508 = dma.vmem_to_hbm [thread:$0]  %s506_s22, 128, %s745_s2, [#allocation3]  }
 0x7e9   :  { %628 = dma.done.wait [#allocation3], 128  }
 0x7ea   :  { %629 = vsyncadd [#allocation3], 4294967168 }
 0x7eb   :  { %512 = vsyncpa [#allocation3], 1 }

</bundles_post_ra>
